<compile_context>
chip_gen: v7x
topology: tpu7x:2x2x1
jax: 0.10.0
libtpu: 0.0.40
codegen_flags: <defaults>
</compile_context>

<pallas_src>
import jax
import jax.numpy as jnp
from jax.experimental import pallas as pl
from jax.experimental.pallas import tpu as pltpu


# ----------------------------- Pallas kernel ------------------------------ #

def _msfocus_kernel(x_ref, w_ref, bias_ref, out_rgb_ref, out_x_ref):
    # x_ref:    (1, Cin, TS)  focused input tile (channels x flattened spatial)
    # w_ref:    (Cout, Cin)   block-diagonal fused 1x1-conv weight, BN scale folded in
    # bias_ref: (Cout, 1)     folded BN bias = beta - mean * gamma / sqrt(var + eps)
    x = x_ref[0]                                               # (Cin, TS)
    y = jnp.dot(w_ref[...], x,
                preferred_element_type=jnp.float32)            # (Cout, TS) f32, MXU
    y = y + bias_ref[...]                                      # BN bias (scale folded in w)
    # SiLU: x * sigmoid(x); approx reciprocal uses the otherwise-idle EUP slot.
    y = y * pl.reciprocal(1.0 + jnp.exp(-y), approx=True)
    c_rgb = out_rgb_ref.shape[1]
    out_rgb_ref[0] = y[:c_rgb].astype(out_rgb_ref.dtype)
    out_x_ref[0] = y[c_rgb:].astype(out_x_ref.dtype)


# ------------------------------ host wrapper ------------------------------ #

def _focus(t):
    # torch: cat((t[..., ::2, ::2], t[..., 1::2, ::2],
    #             t[..., ::2, 1::2], t[..., 1::2, 1::2]), dim=1)
    return jnp.concatenate(
        [t[..., ::2, ::2], t[..., 1::2, ::2], t[..., ::2, 1::2], t[..., 1::2, 1::2]],
        axis=1)


def _spatial_tile(hw2, target=8192):
    """Lane tile for the flattened H/2*W/2 axis.

    * hw2 <= target : single full-extent block (always legal).
    * otherwise     : a 128-multiple <= target; prefer an exact divisor of hw2,
                      else fall back to the cap and let the pl.cdiv grid mask the
                      last (partial) block.  VMEM per block is therefore bounded
                      by the cap for every input shape (no full-extent blowup).
    """
    if hw2 <= target:
        return hw2
    cap = (target // 128) * 128
    t = cap
    while t >= 512:
        if hw2 % t == 0:
            return t
        t -= 128
    return cap


def msfocus_forward(x, w_rgb, w_x, gamma, beta, running_mean, running_var,
                    eps=1e-5):
    """Pallas equivalent of MSFocus_Module.forward (inference-mode BN)."""
    B, C, H, W = x.shape
    assert C % 4 == 0 and H % 2 == 0 and W % 2 == 0
    cq = C // 4                       # channels per chunk(4, dim=1)
    cout_rgb, cin_rgb = w_rgb.shape   # (c2,        3*C)
    cout_x, cin_x = w_x.shape         # (c2//scale, C)
    assert cin_rgb == 3 * C and cin_x == C

    h2, w2 = H // 2, W // 2
    hw2 = h2 * w2
    cin = cin_rgb + cin_x
    cout = cout_rgb + cout_x

    # ---- layout plumbing (zero FLOPs): chunk/split + focus ------------------
    # allow_input_fusion on this operand lets XLA fuse the gather into the
    # kernel's input pipeline instead of materializing x_f in HBM.
    x_rgb = x[:, :3 * cq]
    x_x = x[:, 3 * cq:]
    x_f = jnp.concatenate([_focus(x_rgb), _focus(x_x)], axis=1)   # (B, 4C, h2, w2)
    x_f = x_f.reshape(B, cin, hw2)

    # ---- fold BN (inference) into scale / bias and the scale into the weight --
    f32 = jnp.float32
    inv_std = jax.lax.rsqrt(running_var.astype(f32) + jnp.asarray(eps, f32))
    scale = gamma.astype(f32) * inv_std                               # (cout,)
    bias = (beta.astype(f32) - running_mean.astype(f32) * scale).reshape(cout, 1)

    # ---- fuse the two 1x1 convs into one block-diagonal weight, scale folded --
    w_comb = jnp.zeros((cout, cin), f32)
    w_comb = w_comb.at[:cout_rgb, :cin_rgb].set(w_rgb.astype(f32))
    w_comb = w_comb.at[cout_rgb:, cin_rgb:].set(w_x.astype(f32))
    w_comb = w_comb * scale[:, None]

    ts = _spatial_tile(hw2)
    n_s = pl.cdiv(hw2, ts)

    out_rgb, out_x = pl.pallas_call(
        _msfocus_kernel,
        out_shape=(
            jax.ShapeDtypeStruct((B, cout_rgb, hw2), x.dtype),
            jax.ShapeDtypeStruct((B, cout_x, hw2), x.dtype),
        ),
        grid_spec=pltpu.PrefetchScalarGridSpec(
            num_scalar_prefetch=0,
            grid=(B, n_s),
            in_specs=[
                pl.BlockSpec((1, cin, ts), lambda b, s: (b, 0, s)),
                pl.BlockSpec((cout, cin), lambda b, s: (0, 0)),
                pl.BlockSpec((cout, 1), lambda b, s: (0, 0)),
            ],
            out_specs=[
                pl.BlockSpec((1, cout_rgb, ts), lambda b, s: (b, 0, s)),
                pl.BlockSpec((1, cout_x, ts), lambda b, s: (b, 0, s)),
            ],
        ),
        compiler_params=pltpu.CompilerParams(
            dimension_semantics=("parallel", "parallel"),
            vmem_limit_bytes=32 * 1024 * 1024,
            # let XLA fuse the focus() gather into the kernel input (operand 0)
            allow_input_fusion=[True, False, False],
        ),
    )(x_f, w_comb, bias)

    return (out_rgb.reshape(B, cout_rgb, h2, w2),
            out_x.reshape(B, cout_x, h2, w2))


# --------------------------- pure-JAX reference ---------------------------- #

def msfocus_reference(x, w_rgb, w_x, gamma, beta, running_mean, running_var,
                      eps=1e-5):
    B, C, H, W = x.shape
    cq = C // 4
    cout_rgb = w_rgb.shape[0]
    hi = jax.lax.Precision.HIGHEST
    f_rgb = _focus(x[:, :3 * cq])
    f_x = _focus(x[:, 3 * cq:])
    y_rgb = jnp.einsum("oc,bchw->bohw", w_rgb, f_rgb, precision=hi)
    y_x = jnp.einsum("oc,bchw->bohw", w_x, f_x, precision=hi)
    y = jnp.concatenate([y_rgb, y_x], axis=1)
    inv_std = jax.lax.rsqrt(running_var + eps)
    y = ((y - running_mean[None, :, None, None]) * inv_std[None, :, None, None]
         * gamma[None, :, None, None] + beta[None, :, None, None])
    y = y * (1.0 / (1.0 + jnp.exp(-y)))
    return y[:, :cout_rgb], y[:, cout_rgb:]


if __name__ == "__main__":
    key = jax.random.PRNGKey(0)
    ks = jax.random.split(key, 7)

    # MSFocus_Module defaults: c1=4, c2=64, scale=2 -> cout_rgb=64, cout_x=32
    B, C, H, W = 2, 4, 16, 16
    c2, scale_div = 64, 2
    cout_rgb, cout_x = c2, c2 // scale_div
    cout = cout_rgb + cout_x

    x = jax.random.normal(ks[0], (B, C, H, W), dtype=jnp.float32)
    w_rgb = 0.1 * jax.random.normal(ks[1], (cout_rgb, 3 * C), dtype=jnp.float32)
    w_x = 0.1 * jax.random.normal(ks[2], (cout_x, C), dtype=jnp.float32)
    gamma = 1.0 + 0.1 * jax.random.normal(ks[3], (cout,), dtype=jnp.float32)
    beta = 0.1 * jax.random.normal(ks[4], (cout,), dtype=jnp.float32)
    running_mean = 0.1 * jax.random.normal(ks[5], (cout,), dtype=jnp.float32)
    running_var = 1.0 + 0.1 * jax.random.uniform(ks[6], (cout,), dtype=jnp.float32)

    fwd = jax.jit(msfocus_forward)
    out_rgb, out_x = fwd(x, w_rgb, w_x, gamma, beta, running_mean, running_var)
    out_rgb, out_x = jax.block_until_ready((out_rgb, out_x))

    ref_rgb, ref_x = msfocus_reference(x, w_rgb, w_x, gamma, beta,
                                       running_mean, running_var)

    assert out_rgb.shape == (B, cout_rgb, H // 2, W // 2)
    assert out_x.shape == (B, cout_x, H // 2, W // 2)
    assert jnp.allclose(out_rgb, ref_rgb, atol=5e-3, rtol=5e-3)
    assert jnp.allclose(out_x, ref_x, atol=5e-3, rtol=5e-3)

    print("KERNEL_OK")
</pallas_src>

<mosaic_0001>
module attributes {stable_mosaic.version = 11 : i64} {
  func.func @_msfocus_kernel(%arg0: i32, %arg1: i32, %arg2: memref<1x16x64xf32, #tpu.memory_space<vmem>>, %arg3: memref<96x16xf32, #tpu.memory_space<vmem>>, %arg4: memref<96x1xf32, #tpu.memory_space<vmem>>, %arg5: memref<1x64x64xf32, #tpu.memory_space<vmem>>, %arg6: memref<1x32x64xf32, #tpu.memory_space<vmem>>) attributes {dimension_semantics = [#tpu.dimension_semantics<parallel>, #tpu.dimension_semantics<parallel>], iteration_bounds = array<i64: 2, 1>, scalar_prefetch = 0 : i64, scratch_operands = 0 : i64, tpu.core_type = #tpu.core_type<tc>, window_params = [{transform_indices = @transform_0, window_bounds = array<i64: 1, 16, 64>}, {pipeline_mode = #tpu.pipeline_mode<synchronous>, transform_indices = @transform_1, window_bounds = array<i64: 96, 16>}, {pipeline_mode = #tpu.pipeline_mode<synchronous>, transform_indices = @transform_2, window_bounds = array<i64: 96, 1>}, {transform_indices = @transform_3, window_bounds = array<i64: 1, 64, 64>}, {transform_indices = @transform_4, window_bounds = array<i64: 1, 32, 64>}]} {
    %c0 = arith.constant 0 : index
    %c0_0 = arith.constant 0 : index
    %c0_1 = arith.constant 0 : index
    %0 = vector.load %arg2[%c0, %c0_0, %c0_1] : memref<1x16x64xf32, #tpu.memory_space<vmem>>, vector<1x16x64xf32>
    %1 = vector.shape_cast %0 : vector<1x16x64xf32> to vector<16x64xf32>
    %c0_2 = arith.constant 0 : index
    %c0_3 = arith.constant 0 : index
    %2 = vector.load %arg3[%c0_2, %c0_3] : memref<96x16xf32, #tpu.memory_space<vmem>>, vector<96x16xf32>
    %cst = arith.constant dense<0.000000e+00> : vector<96x64xf32>
    %3 = tpu.matmul %2, %1, %cst {dimension_numbers = #tpu.dot_dimension_numbers<[1], [0], [0], [1], [0, 0, 1, 1], [], []>} : vector<96x16xf32>, vector<16x64xf32>, vector<96x64xf32> -> vector<96x64xf32>
    %c0_4 = arith.constant 0 : index
    %c0_5 = arith.constant 0 : index
    %4 = vector.load %arg4[%c0_4, %c0_5] : memref<96x1xf32, #tpu.memory_space<vmem>>, vector<96x1xf32>
    %5 = vector.broadcast %4 : vector<96x1xf32> to vector<96x64xf32>
    %6 = arith.addf %3, %5 : vector<96x64xf32>
    %cst_6 = arith.constant 0.000000e+00 : f32
    %7 = vector.broadcast %cst_6 : f32 to vector<96x64xf32>
    %8 = arith.subf %7, %6 : vector<96x64xf32>
    %9 = math.exp %8 : vector<96x64xf32>
    %cst_7 = arith.constant 1.000000e+00 : f32
    %10 = vector.broadcast %cst_7 : f32 to vector<96x64xf32>
    %11 = arith.addf %10, %9 : vector<96x64xf32>
    %12 = tpu.reciprocal %11 {approx = true} : vector<96x64xf32> -> vector<96x64xf32>
    %13 = arith.mulf %6, %12 : vector<96x64xf32>
    %14 = vector.extract_strided_slice %13 {offsets = [0, 0], sizes = [64, 64], strides = [1, 1]} : vector<96x64xf32> to vector<64x64xf32>
    %c0_8 = arith.constant 0 : index
    %c0_9 = arith.constant 0 : index
    %c0_10 = arith.constant 0 : index
    %15 = vector.load %arg5[%c0_8, %c0_9, %c0_10] : memref<1x64x64xf32, #tpu.memory_space<vmem>>, vector<1x64x64xf32>
    %16 = vector.shape_cast %15 : vector<1x64x64xf32> to vector<64x64xf32>
    %17 = vector.shape_cast %14 : vector<64x64xf32> to vector<1x64x64xf32>
    tpu.vector_store %arg5[%c0_8, %c0_9, %c0_10], %17 {strides = array<i32>} : memref<1x64x64xf32, #tpu.memory_space<vmem>>, vector<1x64x64xf32>,
    %18 = vector.extract_strided_slice %13 {offsets = [64, 0], sizes = [32, 64], strides = [1, 1]} : vector<96x64xf32> to vector<32x64xf32>
    %c0_11 = arith.constant 0 : index
    %c0_12 = arith.constant 0 : index
    %c0_13 = arith.constant 0 : index
    %19 = vector.load %arg6[%c0_11, %c0_12, %c0_13] : memref<1x32x64xf32, #tpu.memory_space<vmem>>, vector<1x32x64xf32>
    %20 = vector.shape_cast %19 : vector<1x32x64xf32> to vector<32x64xf32>
    %21 = vector.shape_cast %18 : vector<32x64xf32> to vector<1x32x64xf32>
    tpu.vector_store %arg6[%c0_11, %c0_12, %c0_13], %21 {strides = array<i32>} : memref<1x32x64xf32, #tpu.memory_space<vmem>>, vector<1x32x64xf32>,
    return
  }
  func.func @transform_0(%arg0: i32, %arg1: i32) -> (i32, i32, i32) {
    %c0_i32 = arith.constant 0 : i32
    %c0_i32_0 = arith.constant 0 : i32
    return %arg0, %c0_i32, %arg1 : i32, i32, i32
  }
  func.func @transform_1(%arg0: i32, %arg1: i32) -> (i32, i32) {
    %c0_i32 = arith.constant 0 : i32
    %c0_i32_0 = arith.constant 0 : i32
    %c0_i32_1 = arith.constant 0 : i32
    return %c0_i32, %c0_i32_0 : i32, i32
  }
  func.func @transform_2(%arg0: i32, %arg1: i32) -> (i32, i32) {
    %c0_i32 = arith.constant 0 : i32
    %c0_i32_0 = arith.constant 0 : i32
    %c0_i32_1 = arith.constant 0 : i32
    return %c0_i32, %c0_i32_0 : i32, i32
  }
  func.func @transform_3(%arg0: i32, %arg1: i32) -> (i32, i32, i32) {
    %c0_i32 = arith.constant 0 : i32
    %c0_i32_0 = arith.constant 0 : i32
    return %arg0, %c0_i32, %arg1 : i32, i32, i32
  }
  func.func @transform_4(%arg0: i32, %arg1: i32) -> (i32, i32, i32) {
    %c0_i32 = arith.constant 0 : i32
    %c0_i32_0 = arith.constant 0 : i32
    return %arg0, %c0_i32, %arg1 : i32, i32, i32
  }
}

</mosaic_0001>

<bundles_post_ra>
// kernel: msfocus_forward.1
= control target key start
LH: loop header
LB: loop body
LE: loop exit
PB: predicated region body
PF: predicated region fallthrough
CT: control target
= control target key end

     0   :  { %s908_s15 = smov 0   ;;  %s910_s16 = smov 0   ;;  %s1103_s0 = inlined_call_operand.vmem [shape: f32[2,16,64], index: 0, kind: input, shape index: {}]   ;;  %s1104_s1 = inlined_call_operand.vmem [shape: f32[96,16], index: 1, kind: input, shape index: {}]   ;;  %s1105_s2 = inlined_call_operand.vmem [shape: f32[96,1], index: 2, kind: input, shape index: {}]   ;;  %s1106_s3 = inlined_call_operand.vmem [shape: f32[2,64,64], index: 3, kind: output, shape index: {0}]   ;;  %s1107_s4 = inlined_call_operand.vmem [shape: f32[2,32,64], index: 4, kind: output, shape index: {1}]  }
   0x1   :  { %s912_s17 = smov 0  }
   0x2 LB: > { %s27_s18 = sadd.s32 1, %s876_s16  ;;  %p717_p0 = scmp.ge.s32.totalorder %s880_s17, 1  ;;  %s880_s17 = sphi %s912_s17, %s15_s17   ;;  %s876_s16 = sphi %s910_s16, %s1109_s16   ;;  %s872_s15 = sphi %s908_s15, %s1108_s15  }
   0x3   : > { %p29_p1 = scmp.ge.s32.totalorder %s27_s18, 2  ;;  %p186_p2 = scmp.lt.s32.totalorder %s880_s17, 3 }
   0x5   : > { %s1111_s18 = smov (%p29_p1, %s27_s18), 0  ;;  %p187_p3 = pnand %p717_p0, %p186_p2 }
   0x6   : > { %p226_p4 = scmp.lt.s32.totalorder (!%p187_p3), %s872_s15, 1  ;;  %v252_v0 = vld [vmem:[%s1104_s1] sm:$0xff] (!%p187_p3)  ;;  %vm336_vm0 = vcmask (!%p187_p3), 130048   ;;  %v258_v1 = vld [vmem:[%s1104_s1 + $0x30] sm:$0xff] (!%p187_p3)  ;;  %v882_v2 = vmov (!%p187_p3), 0   ;;  %v267_v8 = vld [vmem:[%s1105_s2 + $0x18] sm:$0xff] (!%p187_p3) }
   0x7   : > { %190 = sbr.rel (%p187_p3) target bundleno = 280 (0x118), region = 32  ;;  %759 = vmatprep.mubr.msk.f32.mxu0 (!%p187_p3), %vm336_vm0, %v252_v0  ;;  %768 = vmatprep.mubr.msk.f32.mxu1 (!%p187_p3), %vm336_vm0, %v258_v1  ;;  %v266_v3 = vld [vmem:[%s1105_s2 + $0x10] sm:$0xff] (!%p187_p3)  ;;  %v264_v4 = vld [vmem:[%s1105_s2] sm:$0xff] (!%p187_p3)  ;;  %v265_v9 = vld [vmem:[%s1105_s2 + $0x8] sm:$0xff] (!%p187_p3)  ;;  %vm570_vm1 = vcmask (!%p187_p3), 523264  }
   0x8   : > { %809 = vset.pattern.permute.xlu1 (!%p187_p3), %v882_v2  ;;  %808 = vset.pattern.permute.xlu0 (!%p187_p3), %v882_v2  ;;  %v253_v10 = vld [vmem:[%s1104_s1 + $0x8] sm:$0xff] (!%p187_p3)  ;;  %v259_v11 = vld [vmem:[%s1104_s1 + $0x38] sm:$0xff] (!%p187_p3)  ;;  %v254_v12 = vld [vmem:[%s1104_s1 + $0x10] sm:$0xff] (!%p187_p3) }
   0x9   : > { %288 = vperm.xlu1 (!%p187_p3), %809, %v266_v3   ;;  %278 = vperm.xlu0 (!%p187_p3), %808, %v264_v4   ;;  %v260_v13 = vld [vmem:[%s1104_s1 + $0x40] sm:$0xff] (!%p187_p3)  ;;  %v269_v14 = vld [vmem:[%s1105_s2 + $0x28] sm:$0xff] (!%p187_p3)  ;;  %v255_v16 = vld [vmem:[%s1104_s1 + $0x18] sm:$0xff] (!%p187_p3) }
   0xa   : > { %v268_v15 = vld [vmem:[%s1105_s2 + $0x20] sm:$0xff] (!%p187_p3)  ;;  %v261_v17 = vld [vmem:[%s1104_s1 + $0x48] sm:$0xff] (!%p187_p3)  ;;  %v262_v19 = vld [vmem:[%s1104_s1 + $0x50] sm:$0xff] (!%p187_p3) }
   0xb   : > { %v256_v18 = vld [vmem:[%s1104_s1 + $0x20] sm:$0xff] (!%p187_p3)  ;;  %v271_v20 = vld [vmem:[%s1105_s2 + $0x38] sm:$0xff] (!%p187_p3)  ;;  %v270_v21 = vld [vmem:[%s1105_s2 + $0x30] sm:$0xff] (!%p187_p3) }
   0xc   : > { %v257_v22 = vld [vmem:[%s1104_s1 + $0x28] sm:$0xff] (!%p187_p3)  ;;  %v263_v23 = vld [vmem:[%s1104_s1 + $0x58] sm:$0xff] (!%p187_p3)  ;;  %v272_v25 = vld [vmem:[%s1105_s2 + $0x40] sm:$0xff] (!%p187_p3) }
   0xd   : > { %293 = vperm.xlu1 (!%p187_p3), %809, %v267_v8   ;;  %283 = vperm.xlu0 (!%p187_p3), %808, %v265_v9   ;;  %v273_v24 = vld [vmem:[%s1105_s2 + $0x48] sm:$0xff] (!%p187_p3)  ;;  %v275_v26 = vld [vmem:[%s1105_s2 + $0x58] sm:$0xff] (!%p187_p3)  ;;  %v274_v27 = vld [vmem:[%s1105_s2 + $0x50] sm:$0xff] (!%p187_p3) }
   0xe   : > { %s1113_s15 = smov (!%p226_p4, %s872_s15), 1 }
   0xf   : > { %s738_s23 = sshll.u32 %s1113_s15, 4  ;;  %s739_s27 = sshll.u32 %s1113_s15, 6 }
  0x10   : > { %s233_s30 = scalar_lea.vmem %s1103_s0, %s738_s23  ;;  %s740_s5 = sshll.u32 %s1113_s15, 5 }
  0x11   : > { %v250_v5 = vld [vmem:[%s233_s30] sm:$0xff]  ;;  %v251_v6 = vld [vmem:[%s233_s30 + $0x8] sm:$0xff]  ;;  %303 = vperm.xlu1 %809, %v269_v14   ;;  %298 = vperm.xlu0 %808, %v268_v15   ;;  %s1056_s30 = scalar_lea.vmem %s1106_s3, %s739_s27  ;;  %s249_s15 = scalar_lea.vmem %s1107_s4, %s740_s5 }
  0x12   : > { %v777_v7 = vpack.c.bf16 %v251_v6, %v250_v5 }
  0x14   : > { %778 = vmatprep.subr.bf16.mxu0 %v777_v7  ;;  %781 = vmatprep.subr.bf16.mxu1 %v777_v7 }
  0x15   : > { %780 = vmatpush3.bf16.msra.mxu0 %v777_v7  ;;  %782 = vmatpush3.bf16.msra.mxu1 %v777_v7 }
  0x16   : > { %313 = vperm.xlu1 %809, %v271_v20   ;;  %308 = vperm.xlu0 %808, %v270_v21  }
  0x18   : > { %760 = vmatmul.mubr.msk.f32.vlgmr.msra.gmra.mrb[0].mxu0 %vm336_vm0, %v253_v10  ;;  %769 = vmatmul.mubr.msk.f32.vlgmr.msra.gmra.mrb[0].mxu1 %vm336_vm0, %v259_v11 }
  0x19   : > { %762 = vmatprep.mubr.msk.f32.mxu0 %vm336_vm0, %v254_v12  ;;  %771 = vmatprep.mubr.msk.f32.mxu1 %vm336_vm0, %v260_v13 }
  0x1a   : > { %323 = vperm.xlu1 %809, %v273_v24   ;;  %318 = vperm.xlu0 %808, %v272_v25  }
  0x1c   : > { %763 = vmatmul.mubr.msk.f32.gmra.mrb[2].mxu0 %vm336_vm0, %v255_v16  ;;  %772 = vmatmul.mubr.msk.f32.gmra.mrb[2].mxu1 %vm336_vm0, %v261_v17 }
  0x1d   : > { %765 = vmatprep.mubr.msk.f32.mxu0 %vm336_vm0, %v256_v18  ;;  %774 = vmatprep.mubr.msk.f32.mxu1 %vm336_vm0, %v262_v19 }
  0x1e   : > { %333 = vperm.xlu1 %809, %v275_v26   ;;  %328 = vperm.xlu0 %808, %v274_v27  }
  0x20   : > { %766 = vmatmul.mubr.msk.f32.gmra.mrb[4].mxu0 %vm336_vm0, %v257_v22  ;;  %775 = vmatmul.mubr.msk.f32.gmra.mrb[4].mxu1 %vm336_vm0, %v263_v23 }
  0x88   : > { %v289_v28 = vpop.permute.xlu1 %288  ;;  %v279_v29 = vpop.permute.xlu0 %278 }
  0x8c   : > { %v294_v30 = vpop.permute.xlu1 %293  ;;  %v284_v31 = vpop.permute.xlu0 %283 }
  0x90   : > { %v304_v32 = vpop.permute.xlu1 %303  ;;  %v299_v33 = vpop.permute.xlu0 %298 }
  0x95   : > { %v314_v34 = vpop.permute.xlu1 %313  ;;  %v309_v35 = vpop.permute.xlu0 %308 }
  0x99   : > { %v324_v36 = vpop.permute.xlu1 %323  ;;  %v319_v45 = vpop.permute.xlu0 %318 }
  0x9d   : > { %v334_v62 = vpop.permute.xlu1 %333  ;;  %v329_v10 = vpop.permute.xlu0 %328 }
  0xeb   : > { %v761_v37 = vpop.f32.mrb[0].mxu0  ;;  %v770_v38 = vpop.f32.mrb[0].mxu1 }
  0xec   : > { %v1016_v39 = vadd.f32 %v761_v37, %v284_v31  ;;  %v1018_v40 = vadd.f32 %v770_v38, %v314_v34  ;;  %v439_v41 = vpop.f32.mrb[1].mxu0  ;;  %v469_v42 = vpop.f32.mrb[1].mxu1 }
  0xed   : > { %v1020_v43 = vadd.f32 %v439_v41, %v279_v29  ;;  %v1022_v44 = vadd.f32 %v469_v42, %v309_v35 }
  0xee   : > { %v499_v46 = vsub.f32 0.0, %v1016_v39  ;;  %v505_v47 = vsub.f32 0.0, %v1018_v40 }
  0xef   : > { %v498_v48 = vsub.f32 0.0, %v1020_v43  ;;  %v504_v49 = vsub.f32 0.0, %v1022_v44  ;;  %v764_v50 = vpop.f32.mrb[2].mxu0  ;;  %v773_v51 = vpop.f32.mrb[2].mxu1 }
  0xf0   : > { %v512_v52 = vmul.f32 1.442695, %v499_v46  ;;  %v524_v53 = vmul.f32 1.442695, %v505_v47  ;;  %v1028_v54 = vadd.f32 %v764_v50, %v294_v30  ;;  %v1030_v55 = vadd.f32 %v773_v51, %v324_v36  ;;  %v449_v56 = vpop.f32.mrb[3].mxu0  ;;  %v479_v57 = vpop.f32.mrb[3].mxu1 }
  0xf1   : > { %v510_v58 = vmul.f32 1.442695, %v498_v48  ;;  %v522_v59 = vmul.f32 1.442695, %v504_v49  ;;  %v1032_v60 = vadd.f32 %v449_v56, %v289_v28  ;;  %v1034_v61 = vadd.f32 %v479_v57, %v319_v45 }
  0xf2   : > { %810 = vpow2.f32 %v512_v52  ;;  %v501_v63 = vsub.f32 0.0, %v1028_v54  ;;  %v507_v0 = vsub.f32 0.0, %v1030_v55 }
  0xf3   : > { %812 = vpow2.f32 %v524_v53  ;;  %v500_v1 = vsub.f32 0.0, %v1032_v60  ;;  %v506_v2 = vsub.f32 0.0, %v1034_v61  ;;  %v767_v3 = vpop.f32.mrb[4].mxu0  ;;  %v776_v4 = vpop.f32.mrb[4].mxu1 }
  0xf4   : > { %814 = vpow2.f32 %v510_v58  ;;  %v516_v5 = vmul.f32 1.442695, %v501_v63  ;;  %v528_v6 = vmul.f32 1.442695, %v507_v0  ;;  %v1040_v7 = vadd.f32 %v767_v3, %v304_v32  ;;  %v459_v8 = vpop.f32.mrb[5].mxu0  ;;  %v489_v9 = vpop.f32.mrb[5].mxu1 }
  0xf5   : > { %816 = vpow2.f32 %v522_v59  ;;  %v514_v11 = vmul.f32 1.442695, %v500_v1  ;;  %v526_v12 = vmul.f32 1.442695, %v506_v2  ;;  %v1042_v13 = vadd.f32 %v776_v4, %v334_v62 }
  0xf6   : > { %818 = vpow2.f32 %v516_v5  ;;  %v503_v14 = vsub.f32 0.0, %v1040_v7  ;;  %v1045_v15 = vadd.f32 %v459_v8, %v299_v33  ;;  %v1047_v16 = vadd.f32 %v489_v9, %v329_v10 }
  0xf7   : > { %820 = vpow2.f32 %v528_v6  ;;  %v509_v17 = vsub.f32 0.0, %v1042_v13 }
  0xf8   : > { %822 = vpow2.f32 %v514_v11  ;;  %v520_v18 = vmul.f32 1.442695, %v503_v14  ;;  %v502_v19 = vsub.f32 0.0, %v1045_v15  ;;  %v508_v20 = vsub.f32 0.0, %v1047_v16 }
  0xf9   : > { %824 = vpow2.f32 %v526_v12  ;;  %v532_v21 = vmul.f32 1.442695, %v509_v17 }
  0xfa   : > { %826 = vpow2.f32 %v520_v18  ;;  %v518_v22 = vmul.f32 1.442695, %v502_v19  ;;  %v530_v23 = vmul.f32 1.442695, %v508_v20 }
  0xfb   : > { %828 = vpow2.f32 %v532_v21 }
  0xfc   : > { %v811_v24 = vpop.eup %810  ;;  %830 = vpow2.f32 %v518_v22 }
  0xfd   : > { %v813_v25 = vpop.eup %812  ;;  %v535_v26 = vadd.f32 1.0, %v811_v24  ;;  %832 = vpow2.f32 %v530_v23 }
  0xfe   : > { %v815_v27 = vpop.eup %814  ;;  %v541_v28 = vadd.f32 1.0, %v813_v25 }
  0xff   : > { %v817_v29 = vpop.eup %816  ;;  %834 = vrcp.f32 %v535_v26  ;;  %v534_v30 = vadd.f32 1.0, %v815_v27 }
 0x100   : > { %v819_v31 = vpop.eup %818  ;;  %836 = vrcp.f32 %v541_v28  ;;  %v540_v32 = vadd.f32 1.0, %v817_v29 }
 0x101   : > { %v821_v33 = vpop.eup %820  ;;  %838 = vrcp.f32 %v534_v30  ;;  %v537_v34 = vadd.f32 1.0, %v819_v31 }
 0x102   : > { %v823_v35 = vpop.eup %822  ;;  %840 = vrcp.f32 %v540_v32  ;;  %v543_v36 = vadd.f32 1.0, %v821_v33 }
 0x103   : > { %v825_v37 = vpop.eup %824  ;;  %842 = vrcp.f32 %v537_v34  ;;  %v536_v38 = vadd.f32 1.0, %v823_v35 }
 0x104   : > { %v827_v41 = vpop.eup %826  ;;  %844 = vrcp.f32 %v543_v36  ;;  %v542_v42 = vadd.f32 1.0, %v825_v37 }
 0x105   : > { %v829_v45 = vpop.eup %828  ;;  %846 = vrcp.f32 %v536_v38  ;;  %v539_v46 = vadd.f32 1.0, %v827_v41 }
 0x106   : > { %v831_v47 = vpop.eup %830  ;;  %848 = vrcp.f32 %v542_v42  ;;  %v545_v48 = vadd.f32 1.0, %v829_v45 }
 0x107   : > { %v833_v49 = vpop.eup %832  ;;  %850 = vrcp.f32 %v539_v46  ;;  %v538_v50 = vadd.f32 1.0, %v831_v47 }
 0x108   : > { %852 = vrcp.f32 %v545_v48  ;;  %v544_v51 = vadd.f32 1.0, %v833_v49 }
 0x109   : > { %v835_v52 = vpop.eup %834  ;;  %854 = vrcp.f32 %v538_v50 }
 0x10a   : > { %v837_v53 = vpop.eup %836  ;;  %v559_v56 = vmul.f32 %v835_v52, %v1016_v39  ;;  %856 = vrcp.f32 %v544_v51 }
 0x10b   : > { %v839_v57 = vpop.eup %838  ;;  %v565_v58 = vmul.f32 %v837_v53, %v1018_v40 }
 0x10c   : > { %v841_v59 = vpop.eup %840  ;;  %572 = vst.msk [vmem:[%s1056_s30 + $0x8] sm:$0xff] %vm570_vm1, %v559_v56  ;;  %v558_v62 = vmul.f32 %v839_v57, %v1020_v43 }
 0x10d   : > { %v843_v63 = vpop.eup %842  ;;  %578 = vst.msk [vmem:[%s1056_s30 + $0x38] sm:$0xff] %vm570_vm1, %v565_v58  ;;  %v564_v0 = vmul.f32 %v841_v59, %v1022_v44 }
 0x10e   : > { %v845_v1 = vpop.eup %844  ;;  %571 = vst.msk [vmem:[%s1056_s30] sm:$0xff] %vm570_vm1, %v558_v62  ;;  %v561_v39 = vmul.f32 %v843_v63, %v1028_v54 }
 0x10f   : > { %v847_v40 = vpop.eup %846  ;;  %577 = vst.msk [vmem:[%s1056_s30 + $0x30] sm:$0xff] %vm570_vm1, %v564_v0  ;;  %v567_v43 = vmul.f32 %v845_v1, %v1030_v55 }
 0x110   : > { %v849_v2 = vpop.eup %848  ;;  %574 = vst.msk [vmem:[%s1056_s30 + $0x18] sm:$0xff] %vm570_vm1, %v561_v39  ;;  %v560_v44 = vmul.f32 %v847_v40, %v1032_v60 }
 0x111   : > { %v851_v3 = vpop.eup %850  ;;  %580 = vst.msk [vmem:[%s249_s15 + $0x8] sm:$0xff] %vm570_vm1, %v567_v43  ;;  %v566_v54 = vmul.f32 %v849_v2, %v1034_v61 }
 0x112   : > { %v853_v4 = vpop.eup %852  ;;  %573 = vst.msk [vmem:[%s1056_s30 + $0x10] sm:$0xff] %vm570_vm1, %v560_v44  ;;  %v563_v5 = vmul.f32 %v851_v3, %v1040_v7 }
 0x113   : > { %v855_v6 = vpop.eup %854  ;;  %579 = vst.msk [vmem:[%s249_s15] sm:$0xff] %vm570_vm1, %v566_v54  ;;  %v569_v55 = vmul.f32 %v853_v4, %v1042_v13 }
 0x114   : > { %v857_v8 = vpop.eup %856  ;;  %576 = vst.msk [vmem:[%s1056_s30 + $0x28] sm:$0xff] %vm570_vm1, %v563_v5  ;;  %v562_v60 = vmul.f32 %v855_v6, %v1045_v15 }
 0x115   : > { %582 = vst.msk [vmem:[%s249_s15 + $0x18] sm:$0xff] %vm570_vm1, %v569_v55  ;;  %v568_v9 = vmul.f32 %v857_v8, %v1047_v16 }
 0x116   : > { %575 = vst.msk [vmem:[%s1056_s30 + $0x20] sm:$0xff] %vm570_vm1, %v562_v60 }
 0x117   : > { %581 = vst.msk [vmem:[%s249_s15 + $0x10] sm:$0xff] %vm570_vm1, %v568_v9 }
 0x118 PF: > { %s15_s17 = sadd.s32 1, %s880_s17   ;;  %s1108_s15 = smov %s876_s16 }
 0x119   : > { %p12_p5 = scmp.ge.s32.totalorder %s15_s17, 4   ;;  %s1109_s16 = smov %s1111_s18 }
 0x11b   :  { %14 = sbr.rel (!%p12_p5) target bundleno = 2 (0x2), region = 74 }

</bundles_post_ra>
